<compile_context>
chip_gen: v7x
topology: tpu7x:2x2x1
jax: 0.10.0
libtpu: 0.0.40
codegen_flags: <defaults>
</compile_context>

<pallas_src>
import math

import jax
import jax.numpy as jnp
from jax.experimental import pallas as pl
from jax.experimental.pallas import tpu as pltpu


def _dist_align_kernel(x_ref, scale_ref, bias_ref, o_ref):
    # x_ref / o_ref: (tile_rows, C) lane-dense tiles; scale_ref / bias_ref: (1, C) f32 rows.
    # TODO(synk): the PyTorch module's mean/var normalization is dead code (overwritten
    # before return) and the train-mode parameter re-init side effect has no functional
    # forward equivalent; revisit if the module ever consumes the normalized value.
    x = x_ref[...].astype(jnp.float32)
    o_ref[...] = (x * scale_ref[...] + bias_ref[...]).astype(o_ref.dtype)


def _round_up(n, m):
    return ((n + m - 1) // m) * m


def _affine_plain(x, scale, bias):
    # Plain-JAX fallback with identical math (f32 compute, cast back to x.dtype).
    out = x.astype(jnp.float32) * scale.astype(jnp.float32) + bias.astype(jnp.float32)
    return out.astype(x.dtype)


def _run_affine_kernel(x2, scale_row, bias_row):
    rows, C = x2.shape
    itemsize = jnp.dtype(x2.dtype).itemsize
    sub = max(8, 32 // itemsize)  # sublane multiple: 8 f32, 16 bf16, 32 int8/fp8

    # ~4 MiB blocks; double-buffered in+out => ~16 MiB VMEM footprint.
    target_block_bytes = 4 * 1024 * 1024
    tile_rows = max(sub, (target_block_bytes // (C * itemsize)) // sub * sub)
    rows_rounded = _round_up(rows, sub)
    tile_rows = min(tile_rows, rows_rounded)
    # Prefer >= 4 grid steps (>= 2 per TensorCore on v7x) when there is enough data.
    if rows_rounded >= 4 * sub:
        tile_rows = min(tile_rows, max(sub, _round_up(pl.cdiv(rows_rounded, 4), sub)))

    grid = pl.cdiv(rows, tile_rows)
    # Nudge odd grids to even so v7x's two TensorCores get balanced work.
    if grid > 1 and grid % 2 == 1:
        alt = max(sub, _round_up(pl.cdiv(rows, grid + 1), sub))
        if pl.cdiv(rows, alt) % 2 == 0:
            tile_rows = alt
            grid = pl.cdiv(rows, alt)

    return pl.pallas_call(
        _dist_align_kernel,
        out_shape=jax.ShapeDtypeStruct((rows, C), x2.dtype),
        grid_spec=pltpu.PrefetchScalarGridSpec(
            num_scalar_prefetch=0,
            grid=(grid,),
            in_specs=[
                pl.BlockSpec((tile_rows, C), lambda i: (i, 0)),
                pl.BlockSpec((1, C), lambda i: (0, 0)),
                pl.BlockSpec((1, C), lambda i: (0, 0)),
            ],
            out_specs=pl.BlockSpec((tile_rows, C), lambda i: (i, 0)),
        ),
        compiler_params=pltpu.CompilerParams(
            dimension_semantics=("parallel",),
            # Covers 4 x ~4 MiB double-buffered blocks + tiny param rows on all of
            # v5e (16 MiB scoped default, 128 MiB physical), v6e, and v7x (64 MiB physical).
            vmem_limit_bytes=32 * 1024 * 1024,
        ),
    )(x2, scale_row, bias_row)


def distribution_alignment(x, scale, bias, *, small_input_bytes=1 << 20):
    """x: (..., D); scale, bias: broadcastable to (D,). Eval-mode DistributionAlignment
    forward: scale * x + bias."""
    orig_shape = x.shape
    D = orig_shape[-1]
    scale1 = jnp.asarray(scale).reshape(D)
    bias1 = jnp.asarray(bias).reshape(D)
    n_elems = x.size
    itemsize = jnp.dtype(x.dtype).itemsize

    # Fold width: multiple of 128 (unmasked, lane-dense vst) and of D (so the channel
    # pattern repeats identically on every folded row under a row-major flatten).
    C = math.lcm(128, D)
    reps = C // D

    # Small-input fast path: XLA's fused elementwise op already hits the roofline there
    # and the pallas_call fixed cost / plumbing would dominate.
    if n_elems * itemsize <= small_input_bytes or n_elems < C:
        return _affine_plain(x, scale1, bias1)

    flat = x.reshape(-1)  # zero-copy row-major flatten
    rows = n_elems // C
    rem = n_elems - rows * C

    scale_row = jnp.tile(scale1.astype(jnp.float32), reps).reshape(1, C)
    bias_row = jnp.tile(bias1.astype(jnp.float32), reps).reshape(1, C)

    if rem == 0:
        # Common case: fully zero-copy in and out, single HBM-roofline pass.
        out2 = _run_affine_kernel(flat.reshape(rows, C), scale_row, bias_row)
        return out2.reshape(orig_shape)

    # Ragged tail (< C elements; always a multiple of D since rows*C is): bulk rows go
    # through the kernel, the tail through a tiny plain-JAX affine, then stitch back.
    bulk = flat[: rows * C].reshape(rows, C)
    tail = flat[rows * C:].reshape(-1, D)
    out_bulk = _run_affine_kernel(bulk, scale_row, bias_row)
    out_tail = _affine_plain(tail, scale1, bias1)
    out_flat = jnp.concatenate([out_bulk.reshape(-1), out_tail.reshape(-1)])
    return out_flat.reshape(orig_shape)


if __name__ == "__main__":
    key = jax.random.PRNGKey(0)
    kx1, kx2, kx3, ks, kb = jax.random.split(key, 5)

    # Shapes consistent with the module: x = (batch, n_heads, seq, head_dim).
    D = 32
    # Parameters per __init__ are ones/zeros; perturb deterministically so the affine is
    # non-trivial (simulating trained parameters).
    scale = jnp.ones((D,), jnp.float32) + 0.1 * jax.random.normal(ks, (D,), jnp.float32)
    bias = jnp.zeros((D,), jnp.float32) + 0.1 * jax.random.normal(kb, (D,), jnp.float32)

    def ref(x):
        # Pure-JAX reference of the PyTorch eval-mode forward.
        return scale.reshape(1, 1, 1, D) * x + bias.reshape(1, 1, 1, D)

    # 1) C-divisible, fully zero-copy kernel path (threshold overridden to force the kernel).
    x1 = jax.random.normal(kx1, (2, 2, 8, D), dtype=jnp.float32)
    o1 = jax.block_until_ready(distribution_alignment(x1, scale, bias, small_input_bytes=0))
    assert o1.shape == x1.shape and o1.dtype == x1.dtype
    assert jnp.max(jnp.abs(o1 - ref(x1))) < 1e-6

    # 2) Ragged path (element count not a multiple of C=128): bulk kernel + tiny tail.
    x2 = jax.random.normal(kx2, (1, 3, 7, D), dtype=jnp.float32)
    o2 = jax.block_until_ready(distribution_alignment(x2, scale, bias, small_input_bytes=0))
    assert o2.shape == x2.shape and o2.dtype == x2.dtype
    assert jnp.max(jnp.abs(o2 - ref(x2))) < 1e-6

    # 3) Multi-block grid (grid == 4, megacore-friendly on v7x).
    x3 = jax.random.normal(kx3, (2, 8, 64, D), dtype=jnp.float32)
    o3 = jax.block_until_ready(distribution_alignment(x3, scale, bias, small_input_bytes=0))
    assert o3.shape == x3.shape and o3.dtype == x3.dtype
    assert jnp.max(jnp.abs(o3 - ref(x3))) < 1e-6

    # 4) Default small-input fast path (plain JAX, no kernel launch).
    o4 = jax.block_until_ready(distribution_alignment(x1, scale, bias))
    assert jnp.max(jnp.abs(o4 - ref(x1))) < 1e-6

    print("KERNEL_OK")
</pallas_src>

<mosaic_0001>
module attributes {stable_mosaic.version = 11 : i64} {
  func.func @_dist_align_kernel(%arg0: i32, %arg1: memref<8x128xf32, #tpu.memory_space<vmem>>, %arg2: memref<1x128xf32, #tpu.memory_space<vmem>>, %arg3: memref<1x128xf32, #tpu.memory_space<vmem>>, %arg4: memref<8x128xf32, #tpu.memory_space<vmem>>) attributes {dimension_semantics = [#tpu.dimension_semantics<parallel>], iteration_bounds = array<i64: 1>, scalar_prefetch = 0 : i64, scratch_operands = 0 : i64, tpu.core_type = #tpu.core_type<tc>, window_params = [{transform_indices = @transform_0, window_bounds = array<i64: 8, 128>}, {pipeline_mode = #tpu.pipeline_mode<synchronous>, transform_indices = @transform_1, window_bounds = array<i64: 1, 128>}, {pipeline_mode = #tpu.pipeline_mode<synchronous>, transform_indices = @transform_2, window_bounds = array<i64: 1, 128>}, {transform_indices = @transform_3, window_bounds = array<i64: 8, 128>}]} {
    %c0 = arith.constant 0 : index
    %c0_0 = arith.constant 0 : index
    %0 = vector.load %arg1[%c0, %c0_0] : memref<8x128xf32, #tpu.memory_space<vmem>>, vector<8x128xf32>
    %c0_1 = arith.constant 0 : index
    %c0_2 = arith.constant 0 : index
    %1 = vector.load %arg2[%c0_1, %c0_2] : memref<1x128xf32, #tpu.memory_space<vmem>>, vector<1x128xf32>
    %2 = vector.broadcast %1 : vector<1x128xf32> to vector<8x128xf32>
    %3 = arith.mulf %0, %2 : vector<8x128xf32>
    %c0_3 = arith.constant 0 : index
    %c0_4 = arith.constant 0 : index
    %4 = vector.load %arg3[%c0_3, %c0_4] : memref<1x128xf32, #tpu.memory_space<vmem>>, vector<1x128xf32>
    %5 = vector.broadcast %4 : vector<1x128xf32> to vector<8x128xf32>
    %6 = arith.addf %3, %5 : vector<8x128xf32>
    %c0_5 = arith.constant 0 : index
    %c0_6 = arith.constant 0 : index
    %7 = vector.load %arg4[%c0_5, %c0_6] : memref<8x128xf32, #tpu.memory_space<vmem>>, vector<8x128xf32>
    tpu.vector_store %arg4[%c0_5, %c0_6], %6 {strides = array<i32>} : memref<8x128xf32, #tpu.memory_space<vmem>>, vector<8x128xf32>,
    return
  }
  func.func @transform_0(%arg0: i32) -> (i32, i32) {
    %c0_i32 = arith.constant 0 : i32
    %c0_i32_0 = arith.constant 0 : i32
    return %arg0, %c0_i32 : i32, i32
  }
  func.func @transform_1(%arg0: i32) -> (i32, i32) {
    %c0_i32 = arith.constant 0 : i32
    %c0_i32_0 = arith.constant 0 : i32
    %c0_i32_1 = arith.constant 0 : i32
    return %c0_i32, %c0_i32_0 : i32, i32
  }
  func.func @transform_2(%arg0: i32) -> (i32, i32) {
    %c0_i32 = arith.constant 0 : i32
    %c0_i32_0 = arith.constant 0 : i32
    %c0_i32_1 = arith.constant 0 : i32
    return %c0_i32, %c0_i32_0 : i32, i32
  }
  func.func @transform_3(%arg0: i32) -> (i32, i32) {
    %c0_i32 = arith.constant 0 : i32
    %c0_i32_0 = arith.constant 0 : i32
    return %arg0, %c0_i32 : i32, i32
  }
}

</mosaic_0001>

<bundles_post_ra>
// kernel: tpu_custom_call.1
= control target key start
LH: loop header
LB: loop body
LE: loop exit
PB: predicated region body
PF: predicated region fallthrough
CT: control target
= control target key end

     0   :  { %8 = vsyncpa [#allocation3], 0  ;;  %s164_s0 = inlined_call_operand.hbm [shape: f32[8,128], index: 0, kind: input, shape index: {}]   ;;  %s165_s1 = inlined_call_operand.vmem [shape: f32[1,128], index: 1, kind: input, shape index: {}]   ;;  %s166_s2 = inlined_call_operand.vmem [shape: f32[1,128], index: 2, kind: input, shape index: {}]   ;;  %s167_s3 = inlined_call_operand.hbm [shape: f32[8,128], index: 3, kind: output, shape index: {}]  }
   0x1   :  { %9 = vsyncpa [#allocation4], 0  ;;  %s112_s12 = smov [#allocation2]   ;;  %s64_s16 = scalar_lea.hbm %s164_s0, 128 }
   0x2   :  { %s16_s13 = sshll.u32 %s112_s12, 4  ;;  %p65_p0 = scmp.ne.s32.totalorder %s164_s0, %s64_s16  ;;  %s17_s13 = int_to_ptr.vmem [resolvable:$true] %s16_s13 }
   0x3   :  { %p68_p1 = scmp.lt.u32.totalorder %s64_s16, %s164_s0 }
   0x5   :  { %p70_p2 = pnand %p68_p1, %p65_p0 }
   0x7   :  { %73 = shalt.err (!%p70_p2)
}
   0x8   :  { %s74_s21 = scalar_lea.vmem %s17_s13, 128  ;;  %p79_p4 = scmp.lt.s32.totalorder %s17_s13, %s17_s13 }
   0x9   :  { %p75_p3 = scmp.ne.s32.totalorder %s17_s13, %s74_s21  ;;  %p80_p5 = scmp.lt.s32.totalorder %s74_s21, %s74_s21 }
   0xb   :  { %p81_p6 = por %p80_p5, %p79_p4 }
   0xd   :  { %p82_p7 = pnand %p81_p6, %p75_p3 }
   0xf   :  { %85 = shalt.err (!%p82_p7)
}
  0x10   :  { %19 = dma.hbm_to_vmem [thread:$0]  %s164_s0, 128, %s17_s13, [#allocation3]  }
  0x11   :  { %108 = dma.done.wait [#allocation3], 128  }
  0x12   :  { %109 = vsyncadd [#allocation3], 4294967168  ;;  %v27_v0 = vld [vmem:[#allocation2] sm:$0xff]  ;;  %s113_s28 = smov [#allocation5]  }
  0x13   :  { %v60_v1 = vld [vmem:[%s165_s1] ss:$0 sm:$0xff]  ;;  %s51_s29 = sshll.u32 %s113_s28, 4  ;;  %s52_s29 = int_to_ptr.vmem [resolvable:$true] %s51_s29 }
  0x14   :  { %v61_v2 = vld [vmem:[%s166_s2] ss:$0 sm:$0xff]  ;;  %v35_v3 = vmul.f32 %v60_v1, %v27_v0  ;;  %s86_s30 = scalar_lea.vmem %s52_s29, 128  ;;  %p91_p9 = scmp.lt.s32.totalorder %s52_s29, %s52_s29 }
  0x15   :  { %p87_p8 = scmp.ne.s32.totalorder %s52_s29, %s86_s30  ;;  %p92_p10 = scmp.lt.s32.totalorder %s86_s30, %s86_s30 }
  0x16   :  { %v43_v4 = vadd.f32 %v61_v2, %v35_v3 }
  0x17   :  { %p93_p11 = por %p92_p10, %p91_p9 }
  0x18   :  { %44 = vst [vmem:[#allocation5] sm:$0xff] %v43_v4 }
  0x19   :  { %p94_p12 = pnand %p93_p11, %p87_p8 }
  0x1b   :  { %97 = shalt.err (!%p94_p12)
}
  0x1c   :  { %s98_s1 = scalar_lea.hbm %s167_s3, 128 }
  0x1d   :  { %p99_p13 = scmp.ne.s32.totalorder %s167_s3, %s98_s1  ;;  %p102_p0 = scmp.lt.u32.totalorder %s98_s1, %s167_s3 }
  0x1f   :  { %p104_p1 = pnand %p102_p0, %p99_p13 }
  0x21   :  { %107 = shalt.err (!%p104_p1)
}
  0x22   :  { %54 = dma.vmem_to_hbm [thread:$0]  %s52_s29, 128, %s167_s3, [#allocation4]  }
  0x23   :  { %110 = dma.done.wait [#allocation4], 128  }
  0x24   :  { %111 = vsyncadd [#allocation4], 4294967168 }
  0x25   :  { %58 = vsyncpa [#allocation3], 1 }
  0x26   :  { %59 = vsyncpa [#allocation4], 1 }

</bundles_post_ra>
